<compile_context>
chip_gen: v5e
topology: v5e:2x2
jax: 0.10.0
libtpu: 0.0.40
codegen_flags: <defaults>
</compile_context>

<pallas_src>
import jax
import jax.numpy as jnp
from jax.experimental import pallas as pl
from jax.experimental.pallas import tpu as pltpu


def _round_up(x: int, m: int) -> int:
    return ((x + m - 1) // m) * m


def _round_down(x: int, m: int) -> int:
    return (x // m) * m


def _vmem_capacity_bytes() -> int:
    """Physical VMEM per TensorCore (64 MiB on v7x, 128 MiB on v5e/v6e)."""
    try:
        info = pltpu.get_tpu_info()
        cap = int(getattr(info, "vmem_capacity_bytes", 0))
        if cap > 0:
            return cap
    except Exception:
        pass
    return 64 << 20  # conservative (v7x per-TC)


# ----------------------------------------------------------------------------
# Fused single-kernel path: whole x resident in VMEM (one HBM read of x total).
# ----------------------------------------------------------------------------
def _make_fused_kernel(n: int, d: int, eps: float):
    inv_n = 1.0 / float(n)
    inv_d = 1.0 / float(d)

    def fused_kernel(x_ref, score_ref):
        x = x_ref[...]                                   # (N, D) f32, one DMA
        pivot = x[0:1, :]                                # per-column pivot
        xc = x - pivot
        mean_c = jnp.sum(xc, axis=0, keepdims=True) * inv_n      # (1, D)
        dev = xc - mean_c                                # == x - mean exactly
        var = jnp.sum(dev * dev, axis=0, keepdims=True) * inv_n  # exact 2-pass
        inv_std = jax.lax.rsqrt(var + eps)               # EUP
        z_abs = jnp.abs(dev * inv_std)                   # (N, D) VPU
        # Row reduction on the MXU, contracting the lane (D) axis of both
        # operands so the per-row score is born lane-major: (8,D)·(N,D)^T.
        lhs = jnp.full((8, d), inv_d, dtype=jnp.float32)
        score_ref[...] = jax.lax.dot_general(
            lhs, z_abs,
            dimension_numbers=(((1,), (1,)), ((), ())),
            preferred_element_type=jnp.float32)          # (8, N) lane-dense

    return fused_kernel


# ----------------------------------------------------------------------------
# Tiled two-pass path (large N).
# ----------------------------------------------------------------------------
def _make_stats_kernel(n: int, d: int, tile_n: int, tiles_per_core: int):
    inv_n = 1.0 / float(n)

    def stats_kernel(pivot_ref, x_ref, s1_ref, s2_ref):
        c = pl.program_id(0)          # "parallel" core-split axis
        j = pl.program_id(1)          # "arbitrary" reduction axis

        @pl.when(j == 0)
        def _init():
            s1_ref[0] = jnp.zeros((1, d), jnp.float32)
            s2_ref[0] = jnp.zeros((1, d), jnp.float32)

        # Unpadded x: mask rows past N (partial tail tile / clamped duplicate
        # blocks from an odd tile split) so they contribute exactly zero.
        row0 = (c * tiles_per_core + j) * tile_n
        rows = jax.lax.broadcasted_iota(jnp.int32, (tile_n, 1), 0) + row0
        valid = rows < n
        xc = jnp.where(valid, x_ref[...] - pivot_ref[...], 0.0)   # (tile_n, D)
        # Column reductions (sublane sums) accumulated into the resident
        # per-core partial outputs; 1/N scale folded in here.
        s1_ref[0] = s1_ref[0] + jnp.sum(xc, axis=0, keepdims=True) * inv_n
        s2_ref[0] = s2_ref[0] + jnp.sum(xc * xc, axis=0, keepdims=True) * inv_n

    return stats_kernel


def _make_detect_kernel(d: int):
    inv_d = 1.0 / float(d)

    def detect_kernel(mean_ref, istd_ref, x_ref, score_ref):
        # Pure stream: load -> 3 VPU ops -> MXU lane-axis contraction -> store.
        z_abs = jnp.abs((x_ref[...] - mean_ref[...]) * istd_ref[...])
        # Tiny (8, D) constant (a few vregs) -- cheap to rebuild per step.
        lhs = jnp.full((8, d), inv_d, dtype=jnp.float32)
        score_ref[...] = jax.lax.dot_general(
            lhs, z_abs,
            dimension_numbers=(((1,), (1,)), ((), ())),
            preferred_element_type=jnp.float32)          # (8, tile_n) lane-dense

    return detect_kernel


# ----------------------------------------------------------------------------
# Wrapper
# ----------------------------------------------------------------------------
def external_detector_forward(x: jax.Array, threshold: float = 1.5,
                              eps: float = 1e-6, compute_selected: bool = True,
                              force_tiled: bool = False, tile_rows=None):
    """Pallas implementation of ExternalDetector.forward.

    Returns (selected_rows_padded, count, anomalies, mask, score):
      selected_rows_padded : (N, D) rows of x flagged anomalous, packed to the
                             front; only the first `count` rows are valid
                             (None when compute_selected=False).
      count                : scalar int32 number of anomalous rows.
      anomalies            : (N,) float32 anomaly series (NaN warm-up at idx 0),
                             mirroring fit_detect's output.
      mask                 : (N,) int32 selection mask (~isna & > 0).
      score                : (N,) float32 per-row anomaly score.
    """
    n, d = x.shape
    x = x.astype(jnp.float32)
    x_bytes = n * d * 4
    cap = _vmem_capacity_bytes()

    # Fused-path gate: x + elementwise temporaries (~4.5x) must fit VMEM.
    fused_budget = int(0.8 * cap) - (2 << 20)
    use_fused = (not force_tiled) and (int(4.5 * x_bytes) <= fused_budget)

    if use_fused:
        vmem_limit = int(min(int(0.85 * cap),
                             max(16 << 20, 5 * x_bytes + (4 << 20))))
        score8 = pl.pallas_call(
            _make_fused_kernel(n, d, eps),
            out_shape=jax.ShapeDtypeStruct((8, n), jnp.float32),
            compiler_params=pltpu.CompilerParams(vmem_limit_bytes=vmem_limit),
        )(x)
    else:
        # ---- row tile from a generation-aware VMEM budget ----
        budget = min(max(int(0.15 * cap), 8 << 20), 24 << 20)
        if tile_rows is None:
            tile_n = budget // (16 * d)          # ~4 tile-sized buffers live
            tile_n = max(128, _round_down(tile_n, 128))
            tile_n = min(tile_n, _round_up(n, 128), 32768)
        else:
            tile_n = max(128, _round_up(int(tile_rows), 128))
        n_tiles = pl.cdiv(n, tile_n)
        n_split = 2 if n_tiles >= 2 else 1       # feeds both v7x TCs; harmless on 1-TC chips
        tiles_per_core = pl.cdiv(n_tiles, n_split)

        tile_bytes = tile_n * d * 4
        # 2x double-buffered x tile + ~2 tile-sized temps + score blocks + stats.
        vmem_need = 4 * tile_bytes + 2 * (8 * tile_n * 4) + 8 * d * 4 + (1 << 20)
        vmem_limit = int(min(int(0.85 * cap),
                             max(int(1.3 * vmem_need), 16 << 20)))

        pivot = x[0:1, :]   # per-column pivot: guards E[x^2]-E[x]^2 cancellation

        def x_map(c, j):
            # Clamp so every DMA stays in bounds; duplicated / partial blocks
            # are zeroed by the in-kernel row mask (intended offset >= N).
            return (jnp.minimum(c * tiles_per_core + j, n_tiles - 1), 0)

        # ---- pass 1: pivot-centered column statistics, per-core partials ----
        part_s1, part_s2 = pl.pallas_call(
            _make_stats_kernel(n, d, tile_n, tiles_per_core),
            out_shape=(jax.ShapeDtypeStruct((n_split, 1, d), jnp.float32),
                       jax.ShapeDtypeStruct((n_split, 1, d), jnp.float32)),
            grid=(n_split, tiles_per_core),
            in_specs=[pl.BlockSpec((1, d), lambda c, j: (0, 0)),
                      pl.BlockSpec((tile_n, d), x_map)],
            out_specs=(pl.BlockSpec((1, 1, d), lambda c, j: (c, 0, 0)),
                       pl.BlockSpec((1, 1, d), lambda c, j: (c, 0, 0))),
            compiler_params=pltpu.CompilerParams(
                dimension_semantics=("parallel", "arbitrary"),
                vmem_limit_bytes=vmem_limit),
        )(pivot, x)

        # Finalize the (tiny) statistics once in the wrapper: sum the per-core
        # partials, un-pivot the mean, clamp the variance, single rsqrt.
        s1 = jnp.sum(part_s1, axis=0)                    # (1, D)  E[x - p]
        s2 = jnp.sum(part_s2, axis=0)                    # (1, D)  E[(x - p)^2]
        var = jnp.maximum(s2 - s1 * s1, 0.0)
        mean = s1 + pivot
        inv_std = jax.lax.rsqrt(var + eps)

        # ---- pass 2: per-row anomaly score, lane-dense (8, N) output ----
        score8 = pl.pallas_call(
            _make_detect_kernel(d),
            out_shape=jax.ShapeDtypeStruct((8, n), jnp.float32),
            grid=(n_tiles,),
            in_specs=[pl.BlockSpec((1, d), lambda j: (0, 0)),
                      pl.BlockSpec((1, d), lambda j: (0, 0)),
                      pl.BlockSpec((tile_n, d), lambda j: (j, 0))],
            out_specs=pl.BlockSpec((8, tile_n), lambda j: (0, j)),
            compiler_params=pltpu.CompilerParams(
                dimension_semantics=("parallel",),       # megacore on v7x
                vmem_limit_bytes=vmem_limit),
        )(mean, inv_std, x)

    score = score8[0, :]                                 # (N,)

    # fit_detect warm-up: first index of the anomaly series is NaN.
    # TODO(synk): ThresholdAD-style score + NaN warm-up is a deterministic proxy
    # for the black-box ADTK detector, not a bit-exact reproduction.
    over = score > threshold
    anomalies = jnp.where(over, 1.0, 0.0).astype(jnp.float32)
    anomalies = anomalies.at[0].set(jnp.nan)

    # _anomalies_to_arrays: ~anomalies.isna() & anomalies > 0 — computed
    # directly (no NaN round-trip); row 0 can never be selected.
    mask = jnp.logical_and(jnp.arange(n) != 0, over).astype(jnp.int32)
    count = jnp.sum(mask).astype(jnp.int32)

    if compute_selected:
        # data.iloc[a_tt] has a data-dependent shape -> padded gather + count.
        # TODO(synk): rows of `selected` beyond `count` are padding (copies of
        # x[0]); skip with compute_selected=False to avoid the extra HBM pass.
        a_tt = jnp.nonzero(mask, size=n, fill_value=0)[0]
        selected = jnp.take(x, a_tt, axis=0)
    else:
        selected = None

    return selected, count, anomalies, mask, score


if __name__ == "__main__":
    key = jax.random.PRNGKey(0)

    def reference(xr, thr=1.5, eps=1e-6):
        mean = jnp.mean(xr, axis=0, keepdims=True)
        var = jnp.mean((xr - mean) ** 2, axis=0, keepdims=True)
        inv_std = jax.lax.rsqrt(var + eps)
        s = jnp.mean(jnp.abs((xr - mean) * inv_std), axis=-1)
        over = s > thr
        m = jnp.logical_and(jnp.arange(xr.shape[0]) != 0, over).astype(jnp.int32)
        return s, m

    # --- small case (fused single-kernel path): seq=16 time steps, 32 features.
    N, D = 16, 32
    x = jax.random.normal(key, (N, D), dtype=jnp.float32)
    x = x.at[5].multiply(8.0)   # obvious anomalies so the detector fires
    x = x.at[10].add(10.0)

    selected, count, anomalies, mask, score = jax.block_until_ready(
        external_detector_forward(x, threshold=1.5))
    ref_score, ref_mask = reference(x)
    assert jnp.allclose(score, ref_score, rtol=1e-4, atol=1e-5)
    assert jnp.array_equal(mask, ref_mask)
    assert bool(jnp.isnan(anomalies[0]))
    assert int(count) == int(jnp.sum(ref_mask))
    c = int(count)
    ref_idx = jnp.nonzero(ref_mask, size=N, fill_value=0)[0]
    assert jnp.allclose(selected[:c], x[ref_idx][:c], rtol=1e-5, atol=1e-5)

    # --- ragged case forced down the tiled two-pass path (unpadded partial
    #     tiles + the 2-way TensorCore split in the stats pass).
    N2, D2 = 300, 32
    x2 = jax.random.normal(jax.random.PRNGKey(1), (N2, D2), dtype=jnp.float32)
    x2 = x2.at[17].add(9.0)
    x2 = x2.at[211].multiply(7.0)
    _, count2, _, mask2, score2 = jax.block_until_ready(
        external_detector_forward(x2, threshold=1.5, compute_selected=False,
                                  force_tiled=True, tile_rows=128))
    ref_score2, ref_mask2 = reference(x2)
    assert jnp.allclose(score2, ref_score2, rtol=1e-4, atol=1e-4)
    assert jnp.array_equal(mask2, ref_mask2)
    assert int(count2) == int(jnp.sum(ref_mask2))

    print("KERNEL_OK")
</pallas_src>

<mosaic_0001>
module attributes {stable_mosaic.version = 11 : i64} {
  func.func @fused_kernel(%arg0: memref<16x32xf32, #tpu.memory_space<vmem>>, %arg1: memref<8x16xf32, #tpu.memory_space<vmem>>) attributes {dimension_semantics = [], scalar_prefetch = 0 : i64, scratch_operands = 0 : i64, tpu.core_type = #tpu.core_type<tc>} {
    %c0 = arith.constant 0 : index
    %c0_0 = arith.constant 0 : index
    %0 = vector.load %arg0[%c0, %c0_0] : memref<16x32xf32, #tpu.memory_space<vmem>>, vector<16x32xf32>
    %1 = vector.extract_strided_slice %0 {offsets = [0, 0], sizes = [1, 32], strides = [1, 1]} : vector<16x32xf32> to vector<1x32xf32>
    %2 = vector.broadcast %1 : vector<1x32xf32> to vector<16x32xf32>
    %3 = arith.subf %0, %2 : vector<16x32xf32>
    %cst = arith.constant dense<0.000000e+00> : vector<32xf32>
    %4 = vector.multi_reduction <add>, %3, %cst [0] : vector<16x32xf32> to vector<32xf32>
    %5 = vector.shape_cast %4 : vector<32xf32> to vector<1x32xf32>
    %cst_1 = arith.constant 6.250000e-02 : f32
    %6 = vector.broadcast %cst_1 : f32 to vector<1x32xf32>
    %7 = arith.mulf %5, %6 : vector<1x32xf32>
    %8 = vector.broadcast %7 : vector<1x32xf32> to vector<16x32xf32>
    %9 = arith.subf %3, %8 : vector<16x32xf32>
    %10 = arith.mulf %9, %9 : vector<16x32xf32>
    %cst_2 = arith.constant dense<0.000000e+00> : vector<32xf32>
    %11 = vector.multi_reduction <add>, %10, %cst_2 [0] : vector<16x32xf32> to vector<32xf32>
    %12 = vector.shape_cast %11 : vector<32xf32> to vector<1x32xf32>
    %cst_3 = arith.constant 6.250000e-02 : f32
    %13 = vector.broadcast %cst_3 : f32 to vector<1x32xf32>
    %14 = arith.mulf %12, %13 : vector<1x32xf32>
    %cst_4 = arith.constant 9.99999997E-7 : f32
    %15 = vector.broadcast %cst_4 : f32 to vector<1x32xf32>
    %16 = arith.addf %14, %15 : vector<1x32xf32>
    %17 = math.rsqrt %16 : vector<1x32xf32>
    %18 = vector.broadcast %17 : vector<1x32xf32> to vector<16x32xf32>
    %19 = arith.mulf %9, %18 : vector<16x32xf32>
    %20 = math.absf %19 : vector<16x32xf32>
    %cst_5 = arith.constant 3.125000e-02 : f32
    %21 = vector.broadcast %cst_5 : f32 to vector<8x32xf32>
    %cst_6 = arith.constant dense<0.000000e+00> : vector<8x16xf32>
    %22 = tpu.matmul %21, %20, %cst_6 {dimension_numbers = #tpu.dot_dimension_numbers<[1], [1], [0], [0], [0, 0, 1, 0], [], []>} : vector<8x32xf32>, vector<16x32xf32>, vector<8x16xf32> -> vector<8x16xf32>
    %c0_7 = arith.constant 0 : index
    %c0_8 = arith.constant 0 : index
    %23 = vector.load %arg1[%c0_7, %c0_8] : memref<8x16xf32, #tpu.memory_space<vmem>>, vector<8x16xf32>
    tpu.vector_store %arg1[%c0_7, %c0_8], %22 {strides = array<i32>} : memref<8x16xf32, #tpu.memory_space<vmem>>, vector<8x16xf32>,
    return
  }
}

</mosaic_0001>

<bundles_post_ra>
// kernel: tpu_custom_call.1
= control target key start
LH: loop header
LB: loop body
LE: loop exit
PB: predicated region body
PF: predicated region fallthrough
CT: control target
= control target key end

     0   :  { %6 = vsyncpa [#allocation3], 0  ;;  %s208_s0 = inlined_call_operand.hbm [shape: f32[16,32], index: 0, kind: input, shape index: {}]   ;;  %s209_s1 = inlined_call_operand.hbm [shape: f32[8,16], index: 1, kind: output, shape index: {}]  }
   0x1   :  { %7 = vsyncpa [#allocation4], 0  ;;  %s12_s8 = sshll.u32 %s208_s0, 4  ;;  %s180_s9 = smov [#allocation2]   ;;  %s13_s8 = int_to_ptr.hbm [resolvable:$true] %s12_s8 }
   0x2   :  { %s14_s10 = sshll.u32 %s180_s9, 4  ;;  %s181_s11 = smov 128   ;;  %s15_s10 = int_to_ptr.vmem [resolvable:$true] %s14_s10 }
   0x3   :  { %s182_s12 = smov 8  }
   0x4   :  { %20 = dma.hbm_to_vmem [thread:$0]  %s13_s8, 256, %s15_s10, [#allocation3], %s181_s11, %s181_s11, %s182_s12  }
   0x5   :  { %176 = dma.done.wait [#allocation3], 256  }
   0x6   :  { %177 = vsyncadd [#allocation3], 4294967040  ;;  %v25_v0 = vld [vmem:[#allocation2] sm:$0xff]  ;;  %v26_v1 = vld [vmem:[#allocation2 + $0x8] sm:$0xff]  ;;  %vm30_vm0 = vcmask 261120   ;;  %v183_v41 = vmov 0.03125  }
   0x7   :  { %v27_v2 = vperm.slane %v25_v0, 0  ;;  %s184_s0 = smov [#allocation5]   ;;  %s108_s16 = sshll.u32 %s209_s1, 4  ;;  %vm99_vm4 = vcmask 130048   ;;  %s109_s16 = int_to_ptr.hbm [resolvable:$true] %s108_s16 }
   0x8   :  { %s106_s13 = sshll.u32 %s184_s0, 4  ;;  %s107_s13 = int_to_ptr.vmem [resolvable:$true] %s106_s13 }
   0x9   :  { %v28_v3 = vsub.f32 %v25_v0, %v27_v2  ;;  %v29_v4 = vsub.f32 %v26_v1, %v27_v2 }
   0xb   :  { %v31_v5 = vsel %vm30_vm0, %v28_v3, 0.0  ;;  %v32_v6 = vsel %vm30_vm0, %v29_v4, 0.0 }
   0xc   :  { %v33_v7 = vadd.f32 %v32_v6, %v31_v5 }
   0xe   :  { %v34_v8 = vrot.slane %v33_v7, 4 }
  0x10   :  { %v35_v9 = vadd.f32 %v34_v8, %v33_v7 }
  0x12   :  { %v36_v10 = vrot.slane %v35_v9, 2 }
  0x14   :  { %v37_v11 = vadd.f32 %v36_v10, %v35_v9 }
  0x16   :  { %v38_v12 = vrot.slane %v37_v11, 1 }
  0x18   :  { %v39_v13 = vadd.f32 %v38_v12, %v37_v11 }
  0x1a   :  { %v40_v14 = vmul.f32 0.0625, %v39_v13 }
  0x1c   :  { %v41_v15 = vsub.f32 %v28_v3, %v40_v14  ;;  %v42_v16 = vsub.f32 %v29_v4, %v40_v14 }
  0x1e   :  { %v43_v17 = vmul.f32 %v41_v15, %v41_v15  ;;  %v44_v18 = vmul.f32 %v42_v16, %v42_v16 }
  0x20   :  { %v45_v19 = vsel %vm30_vm0, %v43_v17, 0.0  ;;  %v46_v20 = vsel %vm30_vm0, %v44_v18, 0.0 }
  0x21   :  { %v47_v21 = vadd.f32 %v46_v20, %v45_v19 }
  0x23   :  { %v48_v22 = vrot.slane %v47_v21, 4 }
  0x25   :  { %v49_v23 = vadd.f32 %v48_v22, %v47_v21 }
  0x27   :  { %v50_v24 = vrot.slane %v49_v23, 2 }
  0x29   :  { %v51_v25 = vadd.f32 %v50_v24, %v49_v23 }
  0x2b   :  { %v52_v26 = vrot.slane %v51_v25, 1 }
  0x2d   :  { %v53_v27 = vadd.f32 %v52_v26, %v51_v25 }
  0x2f   :  { %v54_v28 = vmul.f32 0.0625, %v53_v27 }
  0x31   :  { %v55_v29 = vadd.f32 1e-06, %v54_v28 }
  0x33   :  { %126 = vrsqrt.f32 %v55_v29  ;;  %vm62_vm1 = vweird.f32 %v55_v29 }
  0x39   :  { %v127_v30 = vpop.eup %126 }
  0x3a   :  { %v57_v31 = vmul.f32 %v127_v30, %v55_v29  ;;  %vm63_vm2 = vweird.f32 %v127_v30 }
  0x3b   :  { %vm64_vm3 = vmor %vm62_vm1, %vm63_vm2 }
  0x3c   :  { %v58_v32 = vmul.f32 %v127_v30, %v57_v31 }
  0x3e   :  { %v59_v33 = vmul.f32 0.5, %v58_v32 }
  0x40   :  { %v60_v34 = vsub.f32 1.5, %v59_v33 }
  0x42   :  { %v61_v35 = vmul.f32 %v127_v30, %v60_v34 }
  0x44   :  { %v65_v36 = vsel %vm64_vm3, %v127_v30, %v61_v35 }
  0x45   :  { %v66_v37 = vmul.f32 %v65_v36, %v41_v15  ;;  %v67_v38 = vmul.f32 %v65_v36, %v42_v16 }
  0x47   :  { %v69_v39 = vand.u32 2147483647, %v67_v38  ;;  %v68_v40 = vand.u32 2147483647, %v66_v37 }
  0x49   :  { %118 = vmatpush.xpose.msk.msra.mxu0 %vm30_vm0, %v69_v39 }
  0x4d   :  { %119 = vmatpush.xpose.msk.msra.mxu0 %vm30_vm0, %v68_v40 }
  0x50   :  { %120 = vmatmul.msk.f32.vlgmr.msra.gmra.mxu0 %vm30_vm0, %v183_v41 }
  0xcd   :  { %v96_v42 = vpop.f32.mrf.mxu0 }
  0xce   :  { %100 = vst.msk [vmem:[#allocation5] sm:$0xff] %vm99_vm4, %v96_v42 }
  0xcf   :  { %111 = dma.vmem_to_hbm [thread:$0]  %s107_s13, 128, %s109_s16, [#allocation4]  }
  0xd0   :  { %178 = dma.done.wait [#allocation4], 128  }
  0xd1   :  { %179 = vsyncadd [#allocation4], 4294967168 }
  0xd2   :  { %116 = vsyncpa [#allocation3], 1 }
  0xd3   :  { %117 = vsyncpa [#allocation4], 1 }

</bundles_post_ra>
